<compile_context>
chip_gen: v6e
topology: v6e:2x2x1
jax: 0.10.0
libtpu: 0.0.40
codegen_flags: <defaults>
</compile_context>

<pallas_src>
import jax
import jax.numpy as jnp
from jax.experimental import pallas as pl
from jax.experimental.pallas import tpu as pltpu


def _round_up(x, m):
    return (x + m - 1) // m * m


def _cdiv(a, b):
    return (a + b - 1) // b


def conv_layer_forward(x, weight, bias, stride, *, tg=2048):
    """ConvLayer.forward: ReflectionPad2d(K//2) -> Conv2d(stride). NCHW in/out."""
    N, C, H, W = x.shape
    Cout, Cin, K, Kw = weight.shape
    assert Cin == C and K == Kw
    s = int(stride)
    p = K // 2
    assert p < H and p < W, "ReflectionPad2d requires padding < spatial dims"

    x = x.astype(jnp.float32)
    weight = weight.astype(jnp.float32)
    bias = bias.astype(jnp.float32)

    # Reflection padding (jnp 'reflect' == torch ReflectionPad2d semantics).
    xpad = jnp.pad(x, ((0, 0), (0, 0), (p, p), (p, p)), mode="reflect")
    Hp, Wp = H + 2 * p, W + 2 * p
    Ho = (Hp - K) // s + 1
    Wo = (Wp - K) // s + 1

    halo = (K - 1) // s        # extra phase rows/cols a tap can reach
    Ws = Wo + halo             # flat pixel-row stride (output cols + halo gap)
    s2 = s * s
    CP = _round_up(C, 8)       # 8-aligned contraction dim for the MXU

    # ---- stride-phase relayout (one XLA pass; identity-ish for stride=1) ----
    # xph[n, h0*s+w0, c, i, j] = xpad[n, c, i*s+h0, j*s+w0].  Afterwards tap
    # (kh, kw) of output pixel (oh, ow) is phase (kh%s, kw%s) at flat index
    # (oh*Ws + ow) + (kh//s)*Ws + (kw//s): a static lane offset.
    Hs0 = max(_cdiv(Hp, s), Ho + halo)
    Ws0 = max(_cdiv(Wp, s), Ws)
    xpad = jnp.pad(xpad, ((0, 0), (0, 0), (0, Hs0 * s - Hp), (0, Ws0 * s - Wp)))
    xph = xpad.reshape(N, C, Hs0, s, Ws0, s)
    xph = xph.transpose(0, 3, 5, 1, 2, 4).reshape(N, s2, C, Hs0, Ws0)
    xph = xph[:, :, :, :, :Ws]
    if CP != C:
        xph = jnp.pad(xph, ((0, 0), (0, 0), (0, CP - C), (0, 0), (0, 0)))
    xflat = xph.reshape(N, s2, CP, Hs0 * Ws)

    # ---- tile the flat pixel axis ----
    max_off = halo * Ws + halo                   # largest tap offset
    PADOFF = max(128, _round_up(max_off, 128))   # lane-aligned halo width
    TG = max(128, min(_round_up(tg, 128), _round_up(Ho * Ws, 128)))
    TG = _round_up(max(TG, PADOFF), PADOFF)
    # v7x megacore: prefer >= 2 grid steps so both TensorCores get work.
    if N * _cdiv(Ho * Ws, TG) < 2:
        tg2 = _round_up(max(_cdiv(Ho * Ws, 2), PADOFF), PADOFF)
        TG = min(TG, tg2)
    R = _cdiv(Ho * Ws, TG)
    G_total = R * TG
    L_alloc = (R + 1) * TG   # one spare tile so the last halo fetch stays in range
    Lx = Hs0 * Ws
    if Lx < L_alloc:
        xflat = jnp.pad(xflat, ((0, 0), (0, 0), (0, 0), (0, L_alloc - Lx)))
    else:
        xflat = xflat[:, :, :, :L_alloc]   # never cuts data a valid output reads

    # Per-tap weights (K*K, Cout, CP) and bias as a (Cout, 1) column.
    w_taps = weight.transpose(2, 3, 0, 1).reshape(K * K, Cout, C)
    if CP != C:
        w_taps = jnp.pad(w_taps, ((0, 0), (0, 0), (0, CP - C)))
    bcol = bias.reshape(Cout, 1)

    TGB = TG // PADOFF

    def kernel(a_ref, h_ref, w_ref, b_ref, o_ref, vbuf):
        # Stitch the current tile and the halo of the next tile into one
        # contiguous VMEM window, then accumulate K*K tap matmuls on the MXU.
        vbuf[:, :, :TG] = a_ref[0]
        vbuf[:, :, TG:] = h_ref[0]
        acc = None
        for kh in range(K):
            for kw in range(K):
                ph = (kh % s) * s + (kw % s)
                off = (kh // s) * Ws + (kw // s)
                x_tap = vbuf[ph, :, off:off + TG]        # (CP, TG) f32
                w_tap = w_ref[kh * K + kw]               # (Cout, CP) f32
                d = jnp.dot(w_tap, x_tap, preferred_element_type=jnp.float32)
                acc = d if acc is None else acc + d
        o_ref[0] = acc + b_ref[...]

    flops = 2 * N * G_total * (K * K * CP) * Cout
    bytes_accessed = (N * s2 * CP * (G_total + R * PADOFF) * 4   # tiles + halos
                      + N * Cout * G_total * 4                   # output
                      + K * K * Cout * CP * 4 + Cout * 4)        # weights + bias

    out_flat = pl.pallas_call(
        kernel,
        grid=(N, R),
        in_specs=[
            pl.BlockSpec((1, s2, CP, TG), lambda n, r: (n, 0, 0, r)),
            pl.BlockSpec((1, s2, CP, PADOFF),
                         lambda n, r: (n, 0, 0, (r + 1) * TGB)),
            pl.BlockSpec((K * K, Cout, CP), lambda n, r: (0, 0, 0)),
            pl.BlockSpec((Cout, 1), lambda n, r: (0, 0)),
        ],
        out_specs=pl.BlockSpec((1, Cout, TG), lambda n, r: (n, 0, r)),
        out_shape=jax.ShapeDtypeStruct((N, Cout, G_total), jnp.float32),
        scratch_shapes=[pltpu.VMEM((s2, CP, TG + PADOFF), jnp.float32)],
        compiler_params=pltpu.CompilerParams(
            dimension_semantics=("parallel", "parallel")),
        cost_estimate=pl.CostEstimate(
            flops=flops, transcendentals=0, bytes_accessed=bytes_accessed),
    )(xflat, xflat, w_taps, bcol)

    # (N, Cout, pixels) -> NCHW: free reshape + small slice, no transpose pass.
    out = out_flat[:, :, :Ho * Ws].reshape(N, Cout, Ho, Ws)[:, :, :, :Wo]
    return out


def _reference(x, weight, bias, stride):
    K = weight.shape[2]
    p = K // 2
    xpad = jnp.pad(x, ((0, 0), (0, 0), (p, p), (p, p)), mode="reflect")
    out = jax.lax.conv_general_dilated(
        xpad, weight, (stride, stride), "VALID",
        dimension_numbers=("NCHW", "OIHW", "NCHW"))
    return out + bias[None, :, None, None]


if __name__ == "__main__":
    key = jax.random.PRNGKey(0)
    kx, kwt, kb = jax.random.split(key, 3)

    # ConvLayer(in_channels=4, out_channels=8, kernel_size=3, stride=2)
    Cin, Cout, K = 4, 8, 3
    fan_in = Cin * K * K
    bound = 1.0 / (fan_in ** 0.5)
    weight = jax.random.uniform(kwt, (Cout, Cin, K, K), jnp.float32, -bound, bound)
    bias = jax.random.uniform(kb, (Cout,), jnp.float32, -bound, bound)

    checks = [
        # (shape, stride, tg): stride 2 / stride 1 (multi-tile grid) / odd
        # spatial dims (zero-padded tail paths).
        ((2, Cin, 16, 16), 2, 2048),
        ((2, Cin, 16, 16), 1, 128),
        ((2, Cin, 13, 13), 2, 128),
    ]
    for shape, stride, tg in checks:
        x = jax.random.normal(kx, shape, dtype=jnp.float32)
        out = jax.block_until_ready(
            conv_layer_forward(x, weight, bias, stride, tg=tg))
        ref = _reference(x, weight, bias, stride)
        assert out.shape == ref.shape, (out.shape, ref.shape)
        err = float(jnp.max(jnp.abs(out - ref)))
        assert jnp.allclose(out, ref, atol=1e-2, rtol=1e-2), (shape, stride, err)

    print("KERNEL_OK")
</pallas_src>

<mosaic_0001>
module attributes {stable_mosaic.version = 11 : i64} {
  func.func @kernel(%arg0: i32, %arg1: i32, %arg2: memref<1x4x8x128xf32, #tpu.memory_space<vmem>>, %arg3: memref<1x4x8x128xf32, #tpu.memory_space<vmem>>, %arg4: memref<9x8x8xf32, #tpu.memory_space<vmem>>, %arg5: memref<8x1xf32, #tpu.memory_space<vmem>>, %arg6: memref<1x8x128xf32, #tpu.memory_space<vmem>>, %arg7: memref<4x8x256xf32, #tpu.memory_space<vmem>>) attributes {dimension_semantics = [#tpu.dimension_semantics<parallel>, #tpu.dimension_semantics<parallel>], iteration_bounds = array<i64: 2, 1>, scalar_prefetch = 0 : i64, scratch_operands = 1 : i64, tpu.core_type = #tpu.core_type<tc>, window_params = [{transform_indices = @transform_0, window_bounds = array<i64: 1, 4, 8, 128>}, {transform_indices = @transform_1, window_bounds = array<i64: 1, 4, 8, 128>}, {pipeline_mode = #tpu.pipeline_mode<synchronous>, transform_indices = @transform_2, window_bounds = array<i64: 9, 8, 8>}, {pipeline_mode = #tpu.pipeline_mode<synchronous>, transform_indices = @transform_3, window_bounds = array<i64: 8, 1>}, {transform_indices = @transform_4, window_bounds = array<i64: 1, 8, 128>}]} {
    %c0 = arith.constant 0 : index
    %c0_0 = arith.constant 0 : index
    %c0_1 = arith.constant 0 : index
    %c0_2 = arith.constant 0 : index
    %0 = vector.load %arg2[%c0, %c0_0, %c0_1, %c0_2] : memref<1x4x8x128xf32, #tpu.memory_space<vmem>>, vector<1x4x8x128xf32>
    %1 = vector.shape_cast %0 : vector<1x4x8x128xf32> to vector<4x8x128xf32>
    %c0_3 = arith.constant 0 : index
    %c0_4 = arith.constant 0 : index
    %c0_5 = arith.constant 0 : index
    %2 = vector.load %arg7[%c0_3, %c0_4, %c0_5] : memref<4x8x256xf32, #tpu.memory_space<vmem>>, vector<4x8x128xf32>
    tpu.vector_store %arg7[%c0_3, %c0_4, %c0_5], %1 {strides = array<i32>} : memref<4x8x256xf32, #tpu.memory_space<vmem>>, vector<4x8x128xf32>,
    %c0_6 = arith.constant 0 : index
    %c0_7 = arith.constant 0 : index
    %c0_8 = arith.constant 0 : index
    %c0_9 = arith.constant 0 : index
    %3 = vector.load %arg3[%c0_6, %c0_7, %c0_8, %c0_9] : memref<1x4x8x128xf32, #tpu.memory_space<vmem>>, vector<1x4x8x128xf32>
    %4 = vector.shape_cast %3 : vector<1x4x8x128xf32> to vector<4x8x128xf32>
    %c0_10 = arith.constant 0 : index
    %c0_11 = arith.constant 0 : index
    %c128 = arith.constant 128 : index
    %5 = vector.load %arg7[%c0_10, %c0_11, %c128] : memref<4x8x256xf32, #tpu.memory_space<vmem>>, vector<4x8x128xf32>
    tpu.vector_store %arg7[%c0_10, %c0_11, %c128], %4 {strides = array<i32>} : memref<4x8x256xf32, #tpu.memory_space<vmem>>, vector<4x8x128xf32>,
    %c0_12 = arith.constant 0 : index
    %c0_13 = arith.constant 0 : index
    %c0_14 = arith.constant 0 : index
    %6 = vector.load %arg7[%c0_12, %c0_13, %c0_14] : memref<4x8x256xf32, #tpu.memory_space<vmem>>, vector<1x8x128xf32>
    %7 = vector.shape_cast %6 : vector<1x8x128xf32> to vector<8x128xf32>
    %c0_15 = arith.constant 0 : index
    %c0_16 = arith.constant 0 : index
    %c0_17 = arith.constant 0 : index
    %8 = vector.load %arg4[%c0_15, %c0_16, %c0_17] : memref<9x8x8xf32, #tpu.memory_space<vmem>>, vector<1x8x8xf32>
    %9 = vector.shape_cast %8 : vector<1x8x8xf32> to vector<8x8xf32>
    %cst = arith.constant dense<0.000000e+00> : vector<8x128xf32>
    %10 = tpu.matmul %9, %7, %cst {dimension_numbers = #tpu.dot_dimension_numbers<[1], [0], [0], [1], [0, 0, 1, 1], [], []>} : vector<8x8xf32>, vector<8x128xf32>, vector<8x128xf32> -> vector<8x128xf32>
    %c1 = arith.constant 1 : index
    %c0_18 = arith.constant 0 : index
    %c0_19 = arith.constant 0 : index
    %11 = vector.load %arg7[%c1, %c0_18, %c0_19] : memref<4x8x256xf32, #tpu.memory_space<vmem>>, vector<1x8x128xf32>
    %12 = vector.shape_cast %11 : vector<1x8x128xf32> to vector<8x128xf32>
    %c1_20 = arith.constant 1 : index
    %c0_21 = arith.constant 0 : index
    %c0_22 = arith.constant 0 : index
    %13 = vector.load %arg4[%c1_20, %c0_21, %c0_22] : memref<9x8x8xf32, #tpu.memory_space<vmem>>, vector<1x8x8xf32>
    %14 = vector.shape_cast %13 : vector<1x8x8xf32> to vector<8x8xf32>
    %cst_23 = arith.constant dense<0.000000e+00> : vector<8x128xf32>
    %15 = tpu.matmul %14, %12, %cst_23 {dimension_numbers = #tpu.dot_dimension_numbers<[1], [0], [0], [1], [0, 0, 1, 1], [], []>} : vector<8x8xf32>, vector<8x128xf32>, vector<8x128xf32> -> vector<8x128xf32>
    %16 = arith.addf %10, %15 : vector<8x128xf32>
    %c0_24 = arith.constant 0 : index
    %c0_25 = arith.constant 0 : index
    %c1_26 = arith.constant 1 : index
    %17 = vector.load %arg7[%c0_24, %c0_25, %c1_26] : memref<4x8x256xf32, #tpu.memory_space<vmem>>, vector<1x8x128xf32>
    %18 = vector.shape_cast %17 : vector<1x8x128xf32> to vector<8x128xf32>
    %c2 = arith.constant 2 : index
    %c0_27 = arith.constant 0 : index
    %c0_28 = arith.constant 0 : index
    %19 = vector.load %arg4[%c2, %c0_27, %c0_28] : memref<9x8x8xf32, #tpu.memory_space<vmem>>, vector<1x8x8xf32>
    %20 = vector.shape_cast %19 : vector<1x8x8xf32> to vector<8x8xf32>
    %cst_29 = arith.constant dense<0.000000e+00> : vector<8x128xf32>
    %21 = tpu.matmul %20, %18, %cst_29 {dimension_numbers = #tpu.dot_dimension_numbers<[1], [0], [0], [1], [0, 0, 1, 1], [], []>} : vector<8x8xf32>, vector<8x128xf32>, vector<8x128xf32> -> vector<8x128xf32>
    %22 = arith.addf %16, %21 : vector<8x128xf32>
    %c2_30 = arith.constant 2 : index
    %c0_31 = arith.constant 0 : index
    %c0_32 = arith.constant 0 : index
    %23 = vector.load %arg7[%c2_30, %c0_31, %c0_32] : memref<4x8x256xf32, #tpu.memory_space<vmem>>, vector<1x8x128xf32>
    %24 = vector.shape_cast %23 : vector<1x8x128xf32> to vector<8x128xf32>
    %c3 = arith.constant 3 : index
    %c0_33 = arith.constant 0 : index
    %c0_34 = arith.constant 0 : index
    %25 = vector.load %arg4[%c3, %c0_33, %c0_34] : memref<9x8x8xf32, #tpu.memory_space<vmem>>, vector<1x8x8xf32>
    %26 = vector.shape_cast %25 : vector<1x8x8xf32> to vector<8x8xf32>
    %cst_35 = arith.constant dense<0.000000e+00> : vector<8x128xf32>
    %27 = tpu.matmul %26, %24, %cst_35 {dimension_numbers = #tpu.dot_dimension_numbers<[1], [0], [0], [1], [0, 0, 1, 1], [], []>} : vector<8x8xf32>, vector<8x128xf32>, vector<8x128xf32> -> vector<8x128xf32>
    %28 = arith.addf %22, %27 : vector<8x128xf32>
    %c3_36 = arith.constant 3 : index
    %c0_37 = arith.constant 0 : index
    %c0_38 = arith.constant 0 : index
    %29 = vector.load %arg7[%c3_36, %c0_37, %c0_38] : memref<4x8x256xf32, #tpu.memory_space<vmem>>, vector<1x8x128xf32>
    %30 = vector.shape_cast %29 : vector<1x8x128xf32> to vector<8x128xf32>
    %c4 = arith.constant 4 : index
    %c0_39 = arith.constant 0 : index
    %c0_40 = arith.constant 0 : index
    %31 = vector.load %arg4[%c4, %c0_39, %c0_40] : memref<9x8x8xf32, #tpu.memory_space<vmem>>, vector<1x8x8xf32>
    %32 = vector.shape_cast %31 : vector<1x8x8xf32> to vector<8x8xf32>
    %cst_41 = arith.constant dense<0.000000e+00> : vector<8x128xf32>
    %33 = tpu.matmul %32, %30, %cst_41 {dimension_numbers = #tpu.dot_dimension_numbers<[1], [0], [0], [1], [0, 0, 1, 1], [], []>} : vector<8x8xf32>, vector<8x128xf32>, vector<8x128xf32> -> vector<8x128xf32>
    %34 = arith.addf %28, %33 : vector<8x128xf32>
    %c2_42 = arith.constant 2 : index
    %c0_43 = arith.constant 0 : index
    %c1_44 = arith.constant 1 : index
    %35 = vector.load %arg7[%c2_42, %c0_43, %c1_44] : memref<4x8x256xf32, #tpu.memory_space<vmem>>, vector<1x8x128xf32>
    %36 = vector.shape_cast %35 : vector<1x8x128xf32> to vector<8x128xf32>
    %c5 = arith.constant 5 : index
    %c0_45 = arith.constant 0 : index
    %c0_46 = arith.constant 0 : index
    %37 = vector.load %arg4[%c5, %c0_45, %c0_46] : memref<9x8x8xf32, #tpu.memory_space<vmem>>, vector<1x8x8xf32>
    %38 = vector.shape_cast %37 : vector<1x8x8xf32> to vector<8x8xf32>
    %cst_47 = arith.constant dense<0.000000e+00> : vector<8x128xf32>
    %39 = tpu.matmul %38, %36, %cst_47 {dimension_numbers = #tpu.dot_dimension_numbers<[1], [0], [0], [1], [0, 0, 1, 1], [], []>} : vector<8x8xf32>, vector<8x128xf32>, vector<8x128xf32> -> vector<8x128xf32>
    %40 = arith.addf %34, %39 : vector<8x128xf32>
    %c0_48 = arith.constant 0 : index
    %c0_49 = arith.constant 0 : index
    %c9 = arith.constant 9 : index
    %41 = vector.load %arg7[%c0_48, %c0_49, %c9] : memref<4x8x256xf32, #tpu.memory_space<vmem>>, vector<1x8x128xf32>
    %42 = vector.shape_cast %41 : vector<1x8x128xf32> to vector<8x128xf32>
    %c6 = arith.constant 6 : index
    %c0_50 = arith.constant 0 : index
    %c0_51 = arith.constant 0 : index
    %43 = vector.load %arg4[%c6, %c0_50, %c0_51] : memref<9x8x8xf32, #tpu.memory_space<vmem>>, vector<1x8x8xf32>
    %44 = vector.shape_cast %43 : vector<1x8x8xf32> to vector<8x8xf32>
    %cst_52 = arith.constant dense<0.000000e+00> : vector<8x128xf32>
    %45 = tpu.matmul %44, %42, %cst_52 {dimension_numbers = #tpu.dot_dimension_numbers<[1], [0], [0], [1], [0, 0, 1, 1], [], []>} : vector<8x8xf32>, vector<8x128xf32>, vector<8x128xf32> -> vector<8x128xf32>
    %46 = arith.addf %40, %45 : vector<8x128xf32>
    %c1_53 = arith.constant 1 : index
    %c0_54 = arith.constant 0 : index
    %c9_55 = arith.constant 9 : index
    %47 = vector.load %arg7[%c1_53, %c0_54, %c9_55] : memref<4x8x256xf32, #tpu.memory_space<vmem>>, vector<1x8x128xf32>
    %48 = vector.shape_cast %47 : vector<1x8x128xf32> to vector<8x128xf32>
    %c7 = arith.constant 7 : index
    %c0_56 = arith.constant 0 : index
    %c0_57 = arith.constant 0 : index
    %49 = vector.load %arg4[%c7, %c0_56, %c0_57] : memref<9x8x8xf32, #tpu.memory_space<vmem>>, vector<1x8x8xf32>
    %50 = vector.shape_cast %49 : vector<1x8x8xf32> to vector<8x8xf32>
    %cst_58 = arith.constant dense<0.000000e+00> : vector<8x128xf32>
    %51 = tpu.matmul %50, %48, %cst_58 {dimension_numbers = #tpu.dot_dimension_numbers<[1], [0], [0], [1], [0, 0, 1, 1], [], []>} : vector<8x8xf32>, vector<8x128xf32>, vector<8x128xf32> -> vector<8x128xf32>
    %52 = arith.addf %46, %51 : vector<8x128xf32>
    %c0_59 = arith.constant 0 : index
    %c0_60 = arith.constant 0 : index
    %c10 = arith.constant 10 : index
    %53 = vector.load %arg7[%c0_59, %c0_60, %c10] : memref<4x8x256xf32, #tpu.memory_space<vmem>>, vector<1x8x128xf32>
    %54 = vector.shape_cast %53 : vector<1x8x128xf32> to vector<8x128xf32>
    %c8 = arith.constant 8 : index
    %c0_61 = arith.constant 0 : index
    %c0_62 = arith.constant 0 : index
    %55 = vector.load %arg4[%c8, %c0_61, %c0_62] : memref<9x8x8xf32, #tpu.memory_space<vmem>>, vector<1x8x8xf32>
    %56 = vector.shape_cast %55 : vector<1x8x8xf32> to vector<8x8xf32>
    %cst_63 = arith.constant dense<0.000000e+00> : vector<8x128xf32>
    %57 = tpu.matmul %56, %54, %cst_63 {dimension_numbers = #tpu.dot_dimension_numbers<[1], [0], [0], [1], [0, 0, 1, 1], [], []>} : vector<8x8xf32>, vector<8x128xf32>, vector<8x128xf32> -> vector<8x128xf32>
    %58 = arith.addf %52, %57 : vector<8x128xf32>
    %c0_64 = arith.constant 0 : index
    %c0_65 = arith.constant 0 : index
    %59 = vector.load %arg5[%c0_64, %c0_65] : memref<8x1xf32, #tpu.memory_space<vmem>>, vector<8x1xf32>
    %60 = vector.broadcast %59 : vector<8x1xf32> to vector<8x128xf32>
    %61 = arith.addf %58, %60 : vector<8x128xf32>
    %c0_66 = arith.constant 0 : index
    %c0_67 = arith.constant 0 : index
    %c0_68 = arith.constant 0 : index
    %62 = vector.load %arg6[%c0_66, %c0_67, %c0_68] : memref<1x8x128xf32, #tpu.memory_space<vmem>>, vector<1x8x128xf32>
    %63 = vector.shape_cast %62 : vector<1x8x128xf32> to vector<8x128xf32>
    %64 = vector.shape_cast %61 : vector<8x128xf32> to vector<1x8x128xf32>
    tpu.vector_store %arg6[%c0_66, %c0_67, %c0_68], %64 {strides = array<i32>} : memref<1x8x128xf32, #tpu.memory_space<vmem>>, vector<1x8x128xf32>,
    return
  }
  func.func @transform_0(%arg0: i32, %arg1: i32) -> (i32, i32, i32, i32) {
    %c0_i32 = arith.constant 0 : i32
    %c0_i32_0 = arith.constant 0 : i32
    %c0_i32_1 = arith.constant 0 : i32
    return %arg0, %c0_i32, %c0_i32_0, %arg1 : i32, i32, i32, i32
  }
  func.func @transform_1(%arg0: i32, %arg1: i32) -> (i32, i32, i32, i32) {
    %c1_i32 = arith.constant 1 : i32
    %0 = arith.addi %arg1, %c1_i32 : i32
    %c1_i32_0 = arith.constant 1 : i32
    %1 = arith.muli %0, %c1_i32_0 : i32
    %c0_i32 = arith.constant 0 : i32
    %c0_i32_1 = arith.constant 0 : i32
    %c0_i32_2 = arith.constant 0 : i32
    return %arg0, %c0_i32, %c0_i32_1, %1 : i32, i32, i32, i32
  }
  func.func @transform_2(%arg0: i32, %arg1: i32) -> (i32, i32, i32) {
    %c0_i32 = arith.constant 0 : i32
    %c0_i32_0 = arith.constant 0 : i32
    %c0_i32_1 = arith.constant 0 : i32
    %c0_i32_2 = arith.constant 0 : i32
    return %c0_i32, %c0_i32_0, %c0_i32_1 : i32, i32, i32
  }
  func.func @transform_3(%arg0: i32, %arg1: i32) -> (i32, i32) {
    %c0_i32 = arith.constant 0 : i32
    %c0_i32_0 = arith.constant 0 : i32
    %c0_i32_1 = arith.constant 0 : i32
    return %c0_i32, %c0_i32_0 : i32, i32
  }
  func.func @transform_4(%arg0: i32, %arg1: i32) -> (i32, i32, i32) {
    %c0_i32 = arith.constant 0 : i32
    %c0_i32_0 = arith.constant 0 : i32
    return %arg0, %c0_i32, %arg1 : i32, i32, i32
  }
}

</mosaic_0001>

<bundles_post_ra>
// kernel: tpu_custom_call.1
= control target key start
LH: loop header
LB: loop body
LE: loop exit
PB: predicated region body
PF: predicated region fallthrough
CT: control target
= control target key end

     0   :  { %9 = vsyncpa [#allocation5], 0  ;;  %s1707_s0 = inlined_call_operand.vmem [shape: f32[2,4,8,256], index: 0, kind: input, shape index: {}]   ;;  %s1708_s1 = inlined_call_operand.hbm [shape: f32[2,4,8,256], index: 1, kind: input, shape index: {}]   ;;  %s1709_s2 = inlined_call_operand.vmem [shape: f32[9,8,8], index: 2, kind: input, shape index: {}]   ;;  %s1710_s3 = inlined_call_operand.vmem [shape: f32[8,1], index: 3, kind: input, shape index: {}]   ;;  %s1711_s4 = inlined_call_operand.hbm [shape: f32[2,8,128], index: 4, kind: output, shape index: {}]  }
   0x1   :  { %11 = vsyncpa [#allocation5 + $0x1], 0 }
   0x2   :  { %12 = vsyncpa [#allocation6], 0 }
   0x3   :  { %14 = vsyncpa [#allocation6 + $0x1], 0  ;;  %s1495_s15 = smov 0   ;;  %s1497_s16 = smov 0  }
   0x4   :  { %s1499_s17 = smov 0   ;;  %s1501_s18 = smov 0  }
   0x5   :  { %s1503_s19 = smov 0   ;;  %s1505_s20 = smov 0  }
   0x6 LB: > { %s1183_s21 = sadd.s32 4294967295, %s1457_s20   ;;  %s1184_s22 = sadd.s32 4294967294, %s1457_s20   ;;  %s1457_s20 = sphi %s1505_s20, %s20_s20   ;;  %s1453_s19 = sphi %s1503_s19, %s1722_s19   ;;  %s1449_s18 = sphi %s1501_s18, %s1721_s18   ;;  %s1445_s17 = sphi %s1499_s17, %s1720_s17   ;;  %s1441_s16 = sphi %s1497_s16, %s1719_s16   ;;  %s1437_s15 = sphi %s1495_s15, %s1718_s15  }
   0x7   : > { %s32_s23 = sadd.s32 1, %s1453_s19  ;;  %s41_s24 = sadd.s32 1, %s1445_s17 }
   0x8   : > { %p34_p0 = scmp.ge.s32.totalorder %s32_s23, 2  ;;  %p48_p1 = scmp.ne.s32.totalorder %s1445_s17, %s1441_s16 }
   0x9   : > { %p49_p2 = scmp.eq.s32.totalorder %s1457_s20, 0  ;;  %p84_p3 = scmp.ne.s32.totalorder %s1441_s16, %s1437_s15 }
   0xa   : > { %s1724_s23 = smov (%p34_p0, %s32_s23), 0  ;;  %p85_p5 = scmp.eq.s32.totalorder %s1183_s21, 0 }
   0xb   : > { %p1536_p4 = por %p49_p2, %p48_p1  ;;  %s36_s26 = ssub.s32 %s1453_s19, %s1724_s23 }
   0xc   : > { %p152_p6 = scmp.eq.s32.totalorder %s1183_s21, 1  ;;  %p39_p7 = scmp.eq.s32.totalorder %s36_s26, 0 }
   0xd   : > { %p1542_p8 = por %p85_p5, %p84_p3  ;;  %p158_p10 = scmp.eq.s32.totalorder %s1184_s22, 1 }
   0xe   : > { %p1546_p9 = por %p152_p6, %p48_p1  ;;  %p1712_p12 = scmp.ge.s32.totalorder %s1457_s20, 2 }
   0xf   : > { %s1551_s29 = scalar_select %p39_p7, %s1445_s17, %s41_s24  }
  0x10   : > { %p1553_p11 = por %p158_p10, %p84_p3  ;;  %180 = sbr.rel (%p1712_p12) target bundleno = 44 (0x2c), region = 24 }
  0x15   : > { %183 = sbr.rel (!%p1536_p4) target bundleno = 27 (0x1b), region = 28  ;;  %s185_s5 = sand.u32 (%p1536_p4), 1, %s1445_s17  }
  0x16   : > { %s1218_s6 = sshll.u32 (%p1536_p4), %s1453_s19, 6  ;;  %s1187_s7 = sshll.u32 (%p1536_p4), %s185_s5, 5 }
  0x17   : > { %s191_s10 = scalar_lea.vmem (%p1536_p4), %s1707_s0, %s1218_s6  ;;  %s187_s11 = scalar_lea.vmem (%p1536_p4), [#allocation3], %s1187_s7 }
  0x18   : > { %v226_v0 = vld [vmem:[%s191_s10] sm:$0xff] (%p1536_p4)  ;;  %v228_v1 = vld [vmem:[%s191_s10 + $0x10] sm:$0xff] (%p1536_p4) }
  0x19   : > { %v230_v2 = vld [vmem:[%s191_s10 + $0x20] sm:$0xff] (%p1536_p4)  ;;  %227 = vst [vmem:[%s187_s11] sm:$0xff] (%p1536_p4), %v226_v0  ;;  %229 = vst [vmem:[%s187_s11 + $0x8] sm:$0xff] (%p1536_p4), %v228_v1  ;;  %v232_v3 = vld [vmem:[%s191_s10 + $0x30] sm:$0xff] (%p1536_p4) }
  0x1a   : > { %231 = vst [vmem:[%s187_s11 + $0x10] sm:$0xff] %v230_v2  ;;  %233 = vst [vmem:[%s187_s11 + $0x18] sm:$0xff] %v232_v3 }
  0x1b PF: > { %s240_s12 = sand.u32 1, %s1445_s17   ;;  %s1219_s13 = sshll.u32 %s1453_s19, 10 }
  0x1c   : > { %s1190_s14 = sshll.u32 %s240_s12, 5  ;;  %s1117_s24 = scalar_lea.hbm %s1708_s1, %s1219_s13 }
  0x1d   : > { %s1118_s26 = scalar_lea.hbm %s1117_s24, 128  ;;  %s244_s5 = scalar_lea.vmem [#allocation4], %s1190_s14 }
  0x1e   : > { %s253_s6 = sshll.u32 %s244_s5, 4  ;;  %s241_s7 = scalar_lea.sflag [#allocation5], %s240_s12  ;;  %s254_s6 = int_to_ptr.vmem [resolvable:$true] %s253_s6 }
  0x1f   : > { %s1362_s8 = scalar_lea.vmem %s254_s6, 512  ;;  %s1459_s9 = smov [#allocation4]  }
  0x20   : > { %p1363_p13 = scmp.ne.s32.totalorder %s254_s6, %s1362_s8  ;;  %s1366_s10 = sshll.u32 %s1459_s9, 4  ;;  %s1367_s10 = int_to_ptr.vmem [resolvable:$false] %s1366_s10 }
  0x21   : > { %s1368_s11 = scalar_lea.vmem %s1367_s10, 1024  ;;  %p1369_p2 = scmp.lt.s32.totalorder %s254_s6, %s1367_s10 }
  0x22   : > { %p1364_p0 = pnand %p1363_p13, %p1536_p4  ;;  %p1370_p3 = scmp.lt.s32.totalorder %s1368_s11, %s1362_s8 }
  0x24   : > { %p1365_p1 = pneg %p1364_p0  ;;  %p1371_p5 = por %p1370_p3, %p1369_p2 }
  0x26   : > { %p1372_p6 = pnand %p1371_p5, %p1365_p1 }
  0x28   : > { %1375 = shalt.err (!%p1372_p6)
}
  0x29   : > { %s1460_s13 = smov 256   ;;  %s1461_s14 = smov 128  }
  0x2a   : > { %s1462_s21 = smov 8  }
  0x2b   : > { %1283 = dma.hbm_to_vmem [thread:$0]  (%p1536_p4), %s1118_s26, 512, %s254_s6, %s241_s7, %s1460_s13, %s1461_s14, %s1462_s21  }
  0x2c PF: > { %p1193_p7 = scmp.ge.s32.totalorder %s1457_s20, 1  ;;  %p261_p10 = scmp.lt.s32.totalorder %s1457_s20, 3 }
  0x2e   : > { %p262_p13 = pnand %p1193_p7, %p261_p10 }
  0x2f   : > { %s1579_s12 = sand.u32 (!%p262_p13), 1, %s1441_s16  }
  0x30   : > { %265 = sbr.rel (%p262_p13) target bundleno = 400 (0x190), region = 70  ;;  %s1194_s22 = sshll.u32 (!%p262_p13), %s1579_s12, 5 }
  0x31   : > { %s1582_s24 = scalar_lea.vmem (!%p262_p13), [#allocation3], %s1194_s22  ;;  %s275_s5 = scalar_lea.sflag (!%p262_p13), [#allocation5], %s1579_s12 }
  0x32   : > { %s1585_s8 = scalar_lea.vmem (!%p262_p13), [#allocation4], %s1194_s22 }
  0x35   : > { %1428 = dma.done.wait (%p1542_p8), %s275_s5, 512  }
  0x36   : > { %1430 = vsyncadd (%p1542_p8), %s275_s5, 4294966784  ;;  %v1463_v4 = vmov 0.0   ;;  %vm1464_vm0 = vmmov 0   ;;  %v310_v5 = vld [vmem:[%s1582_s24 + $0x10] sm:$0xff]  ;;  %v308_v6 = vld [vmem:[%s1582_s24] sm:$0xff]  ;;  %vm330_vm1 = vcmask 64512  }
  0x37   : > { %1243 = vmatprep.subr.mxu1 %v1463_v4  ;;  %1238 = vmatprep.subr.mxu0 %v1463_v4  ;;  %s1465_s25 = smov 127   ;;  %v318_v7 = vld [vmem:[%s1585_s8 + $0x10] sm:$0xff]  ;;  %v316_v8 = vld [vmem:[%s1585_s8] sm:$0xff]  ;;  %v309_v9 = vld [vmem:[%s1582_s24 + $0x8] sm:$0xff]  ;;  %s1466_s11 = smov 119   ;;  %v1467_v14 = vmov 0  }
  0x38   : > { %1245 = vmatprep.mubr.msk.f32.mxu1 %vm1464_vm0, %v1463_v4  ;;  %1240 = vmatprep.mubr.msk.f32.mxu0 %vm1464_vm0, %v1463_v4  ;;  %v325_v10 = vld [vmem:[%s1709_s2] sm:$0xff]  ;;  %v1197_v11 = vld [vmem:[%s1709_s2 + $0x8] sm:$0xff]  ;;  %v1202_v12 = vld [vmem:[%s1709_s2 + $0x18] sm:$0xff]  ;;  %s1468_s13 = smov 118   ;;  %vm487_vm2 = vcmask 1039360   ;;  %vm812_vm3 = vcmask 973824  }
  0x39   : > { %726 = vrot.lane.b32.xlu1 %v310_v5, %s1465_s25  ;;  %483 = vrot.lane.b32.xlu0 %v308_v6, %s1465_s25  ;;  %v317_v13 = vld [vmem:[%s1585_s8 + $0x8] sm:$0xff]  ;;  %v1058_v15 = vld [vmem:[%s1710_s3] sm:$0xff]  ;;  %vm981_vm4 = vcmask 965632   ;;  %s1215_s14 = sshll.u32 %s1449_s18, 7  ;;  %s1067_s27 = scalar_lea.sflag [#allocation6], %s1579_s12 }
  0x3a   : > { %1244 = vmatpush3.msra.mxu1 %v308_v6  ;;  %1239 = vmatpush3.msra.mxu0 %v309_v9  ;;  %v1200_v20 = vld [vmem:[%s1709_s2 + $0x10] sm:$0xff]  ;;  %v311_v23 = vld [vmem:[%s1582_s24 + $0x18] sm:$0xff]  ;;  %v1206_v24 = vld [vmem:[%s1709_s2 + $0x28] sm:$0xff]  ;;  %s1469_s24 = smov [#allocation7]  }
  0x3b   : > { %1246 = vmatmul.mubr.msk.f32.vlgmr.msra.gmra.mxu1 %vm330_vm1, %v325_v10  ;;  %1241 = vmatmul.mubr.msk.f32.vlgmr.msra.gmra.mxu0 %vm330_vm1, %v1197_v11  ;;  %v1204_v27 = vld [vmem:[%s1709_s2 + $0x20] sm:$0xff]  ;;  %v1208_v31 = vld [vmem:[%s1709_s2 + $0x30] sm:$0xff]  ;;  %v1210_v32 = vld [vmem:[%s1709_s2 + $0x38] sm:$0xff]  ;;  %s1381_s6 = sshll.u32 %s1469_s24, 4  ;;  %s1382_s6 = int_to_ptr.vmem [resolvable:$false] %s1381_s6 }
  0x3c   : > { %1253 = vmatprep.subr.mxu1 %v1463_v4  ;;  %1248 = vmatprep.subr.mxu0 %v1463_v4  ;;  %v1212_v36 = vld [vmem:[%s1709_s2 + $0x40] sm:$0xff]  ;;  %s1383_s18 = scalar_lea.vmem %s1382_s6, 256 }
  0x3d   : > { %728 = vrot.lane.b32.xlu1 %v318_v7, %s1465_s25  ;;  %485 = vrot.lane.b32.xlu0 %v316_v8, %s1465_s25  ;;  %s1079_s25 = scalar_lea.hbm %s1711_s4, %s1215_s14 }
  0x3e   : > { %1254 = vmatpush3.msra.mxu1 %v310_v5  ;;  %1255 = vmatprep.mubr.msk.f32.mxu1 %vm1464_vm0, %v1463_v4 }
  0x3f   : > { %1263 = vmatprep.subr.mxu1 %v1463_v4  ;;  %1250 = vmatprep.mubr.msk.f32.mxu0 %vm1464_vm0, %v1463_v4 }
  0x40   : > { %1256 = vmatmul.mubr.msk.f32.vlgmr.msra.gmra.mxu1 %vm330_vm1, %v1202_v12  ;;  %1349 = vset.pattern.permute.xlu0 %v1467_v14 }
  0x41   : > { %810 = vrot.lane.b32.xlu1 %v316_v8, %s1466_s11  ;;  %808 = vrot.lane.b32.xlu0 %v308_v6, %s1466_s11 }
  0x42   : > { %1265 = vmatprep.mubr.msk.f32.mxu1 %vm1464_vm0, %v1463_v4 }
  0x45   : > { %897 = vrot.lane.b32.xlu1 %v317_v13, %s1466_s11  ;;  %895 = vrot.lane.b32.xlu0 %v309_v9, %s1466_s11 }
  0x49   : > { %979 = vrot.lane.b32.xlu1 %v316_v8, %s1468_s13  ;;  %977 = vrot.lane.b32.xlu0 %v308_v6, %s1468_s13  ;;  %s1196_s13 = sshll.u32 %s1579_s12, 3 }
  0x4a   : > { %s306_s21 = scalar_lea.vmem [#allocation7], %s1196_s13 }
  0x4b   : > { %s1081_s22 = sshll.u32 %s306_s21, 4  ;;  %s1082_s22 = int_to_ptr.vmem [resolvable:$true] %s1081_s22 }
  0x4c   : > { %s1377_s26 = scalar_lea.vmem %s1082_s22, 128  ;;  %p1384_p1 = scmp.lt.s32.totalorder %s1082_s22, %s1382_s6 }
  0x4d   : > { %1061 = vperm.xlu0 %1349, %v1058_v15   ;;  %p1378_p4 = scmp.ne.s32.totalorder %s1082_s22, %s1377_s26  ;;  %p1385_p2 = scmp.lt.s32.totalorder %s1383_s18, %s1377_s26 }
  0x4f   : > { %p1379_p8 = pnand %p1378_p4, %p1546_p9  ;;  %p1386_p3 = por %p1385_p2, %p1384_p1 }
  0x51   : > { %p1380_p0 = pneg %p1379_p8 }
  0x53   : > { %p1387_p5 = pnand %p1386_p3, %p1380_p0 }
  0xab   : > { %v727_v16 = vpop.permute.xlu1 %726  ;;  %v484_v17 = vpop.permute.xlu0 %483 }
  0xaf   : > { %v729_v18 = vpop.permute.xlu1 %728  ;;  %v486_v19 = vpop.permute.xlu0 %485 }
  0xb0   : > { %v730_v21 = vsel %vm487_vm2, %v727_v16, %v729_v18  ;;  %v488_v22 = vsel %vm487_vm2, %v484_v17, %v486_v19 }
  0xb1   : > { %1249 = vmatpush3.msra.mxu0 %v488_v22  ;;  %1264 = vmatpush3.msra.mxu1 %v730_v21 }
  0xb2   : > { %1251 = vmatmul.mubr.msk.f32.vlgmr.msra.gmra.mxu0 %vm330_vm1, %v1200_v20  ;;  %1258 = vmatprep.subr.mxu0 %v1463_v4 }
  0xb3   : > { %v811_v25 = vpop.permute.xlu1 %810  ;;  %v809_v26 = vpop.permute.xlu0 %808  ;;  %1259 = vmatpush3.msra.mxu0 %v311_v23  ;;  %1260 = vmatprep.mubr.msk.f32.mxu0 %vm1464_vm0, %v1463_v4 }
  0xb4   : > { %v813_v28 = vsel %vm812_vm3, %v809_v26, %v811_v25  ;;  %1268 = vmatprep.subr.mxu0 %v1463_v4  ;;  %1273 = vmatprep.subr.mxu1 %v1463_v4 }
  0xb5   : > { %1266 = vmatmul.mubr.msk.f32.vlgmr.msra.gmra.mxu1 %vm330_vm1, %v1206_v24 }
  0xb6   : > { %1261 = vmatmul.mubr.msk.f32.vlgmr.msra.gmra.mxu0 %vm330_vm1, %v1204_v27  ;;  %1275 = vmatprep.mubr.msk.f32.mxu1 %vm1464_vm0, %v1463_v4 }
  0xb7   : > { %1269 = vmatpush3.msra.mxu0 %v813_v28  ;;  %v898_v29 = vpop.permute.xlu1 %897  ;;  %v896_v30 = vpop.permute.xlu0 %895  ;;  %1270 = vmatprep.mubr.msk.f32.mxu0 %vm1464_vm0, %v1463_v4 }
  0xb8   : > { %v899_v33 = vsel %vm812_vm3, %v896_v30, %v898_v29  ;;  %1278 = vmatprep.subr.mxu0 %v1463_v4 }
  0xb9   : > { %1274 = vmatpush3.msra.mxu1 %v899_v33 }
  0xba   : > { %1271 = vmatmul.mubr.msk.f32.vlgmr.msra.gmra.mxu0 %vm330_vm1, %v1208_v31  ;;  %1276 = vmatmul.mubr.msk.f32.vlgmr.msra.gmra.mxu1 %vm330_vm1, %v1210_v32 }
  0xbb   : > { %v980_v34 = vpop.permute.xlu1 %979  ;;  %v978_v35 = vpop.permute.xlu0 %977  ;;  %1280 = vmatprep.mubr.msk.f32.mxu0 %vm1464_vm0, %v1463_v4 }
  0xbc   : > { %v982_v37 = vsel %vm981_vm4, %v978_v35, %v980_v34 }
  0xbd   : > { %1279 = vmatpush3.msra.mxu0 %v982_v37 }
  0xbe   : > { %1281 = vmatmul.mubr.msk.f32.vlgmr.msra.gmra.mxu0 %vm330_vm1, %v1212_v36 }
  0xc8   : > { %v1062_v62 = vpop.permute.xlu0 %1061 }
  0xfb   : > { %v473_v38 = vpop.f32.mrf.mxu1  ;;  %v400_v39 = vpop.f32.mrf.mxu0 }
  0xfc   : > { %v474_v40 = vadd.f32 %v473_v38, %v400_v39 }
  0xfd   : > { %v1247_v41 = vpop.f32.mrf.mxu1  ;;  %v1242_v42 = vpop.f32.mrf.mxu0 }
 0x100   : > { %v637_v43 = vpop.f32.mrf.mxu1 }
 0x102   : > { %v1257_v44 = vpop.f32.mrf.mxu1 }
 0x172   : > { %v559_v45 = vpop.f32.mrf.mxu0 }
 0x173   : > { %v563_v46 = vadd.f32 %v559_v45, %v474_v40 }
 0x174   : > { %v1252_v47 = vpop.f32.mrf.mxu0 }
 0x175   : > { %v641_v48 = vadd.f32 %v637_v43, %v563_v46  ;;  %v801_v49 = vpop.f32.mrf.mxu1 }
 0x176   : > { %v715_v50 = vpop.f32.mrf.mxu0 }
 0x177   : > { %v719_v51 = vadd.f32 %v715_v50, %v641_v48  ;;  %v1267_v52 = vpop.f32.mrf.mxu1 }
 0x178   : > { %v1262_v53 = vpop.f32.mrf.mxu0 }
 0x179   : > { %v805_v54 = vadd.f32 %v801_v49, %v719_v51 }
 0x17a   : > { %v884_v55 = vpop.f32.mrf.mxu0  ;;  %v970_v56 = vpop.f32.mrf.mxu1 }
 0x17b   : > { %v888_v57 = vadd.f32 %v884_v55, %v805_v54 }
 0x17c   : > { %v1272_v58 = vpop.f32.mrf.mxu0  ;;  %v1277_v59 = vpop.f32.mrf.mxu1 }
 0x17d   : > { %v974_v60 = vadd.f32 %v970_v56, %v888_v57 }
 0x17e   : > { %v1053_v61 = vpop.f32.mrf.mxu0 }
 0x17f   : > { %v1057_v63 = vadd.f32 %v1053_v61, %v974_v60 }
 0x180   : > { %v1282_v0 = vpop.f32.mrf.mxu0 }
 0x181   : > { %v1064_v1 = vadd.f32 %v1062_v62, %v1057_v63 }
 0x183   : > { %1065 = vst [vmem:[%s306_s21] sm:$0xff] %v1064_v1 }
 0x184   : > { %1390 = shalt.err (!%p1387_p5)
}
 0x185   : > { %s1391_s7 = scalar_lea.hbm %s1079_s25, 128  ;;  %s1395_s10 = scalar_lea.hbm %s1711_s4, 256 }
 0x186   : > { %p1392_p6 = scmp.ne.s32.totalorder %s1079_s25, %s1391_s7  ;;  %p1396_p13 = scmp.lt.s32.totalorder %s1079_s25, %s1711_s4 }
 0x187   : > { %p1397_p4 = scmp.lt.s32.totalorder %s1395_s10, %s1391_s7 }
 0x188   : > { %p1393_p7 = pnand %p1392_p6, %p1546_p9 }
 0x189   : > { %p1398_p8 = por %p1397_p4, %p1396_p13 }
 0x18a   : > { %p1394_p10 = pneg %p1393_p7 }
 0x18c   : > { %p1399_p12 = pnand %p1398_p8, %p1394_p10 }
 0x18e   : > { %1402 = shalt.err (!%p1399_p12)
}
 0x18f   : > { %1285 = dma.vmem_to_hbm [thread:$0]  (%p1546_p9), %s1082_s22, 128, %s1079_s25, %s1067_s27  }
 0x190 PF: > { %s1093_s14 = sand.u32 1, %s1437_s15   ;;  %p1717_p0 = scmp.ge.s32.totalorder %s1457_s20, 2 }
 0x191   : > { %s1094_s21 = scalar_lea.sflag [#allocation6], %s1093_s14 }
 0x192   : > { %p1288_p1 = pnand %p1717_p0, %p1553_p11 }
 0x194   : > { %p1289_p2 = pneg %p1288_p1 }
 0x196   : > { %1432 = dma.done.wait (%p1289_p2), %s1094_s21, 128  }
 0x197   : > { %1434 = vsyncadd (%p1289_p2), %s1094_s21, 4294967168  ;;  %s20_s20 = sadd.s32 1, %s1457_s20   ;;  %s1718_s15 = smov %s1441_s16 }
 0x198   : > { %p17_p3 = scmp.ge.s32.totalorder %s20_s20, 4   ;;  %s1719_s16 = smov %s1445_s17 }
 0x199   : > { %s1720_s17 = smov %s1551_s29  ;;  %s1721_s18 = smov %s1453_s19 }
 0x19a   : > { %s1722_s19 = smov %s1724_s23  ;;  %19 = sbr.rel (!%p17_p3) target bundleno = 6 (0x6), region = 138 }
 0x19f   :  { %1099 = vsyncpa [#allocation5], 1 }
 0x1a0   :  { %1101 = vsyncpa [#allocation5 + $0x1], 1 }
 0x1a1   :  { %1102 = vsyncpa [#allocation6], 1 }
 0x1a2   :  { %1104 = vsyncpa [#allocation6 + $0x1], 1 }

</bundles_post_ra>
